<compile_context>
chip_gen: v5e
topology: v5e:2x2
jax: 0.10.0
libtpu: 0.0.40
codegen_flags: <defaults>
</compile_context>

<pallas_src>
import math

import jax
import jax.numpy as jnp
import numpy as np
from jax.experimental import pallas as pl
from jax.experimental.pallas import tpu as pltpu


# ----------------------------------------------------------------------------
# Packed-feature layout constants
# ----------------------------------------------------------------------------
K_IN = 49 + 49 + 49 + 16 + 1   # x1 | x2 | x3 | x4 | ones  = 164
K_PAD = 256                    # input slab padded to lane-dense width
P = 128                        # padded width of every hidden / output slab


# ----------------------------------------------------------------------------
# Pallas kernel: 4 fused MXU matmuls, biases folded in, ReLUs on the VPU.
# ----------------------------------------------------------------------------
def dqn_kernel(x_ref, w1_ref, w2_ref, w3_ref, w4_ref, o_ref):
    # Stage 1: three 3x3 convs (as im2col matmuls) + Linear(16,12), fused block-diag.
    h = jnp.maximum(
        jnp.dot(x_ref[...], w1_ref[...], preferred_element_type=jnp.float32), 0.0)
    # Stage 2: hidden11/12/13/14, fused block-diag -> concat(18,18,18,6) layout.
    h = jnp.maximum(
        jnp.dot(h, w2_ref[...], preferred_element_type=jnp.float32), 0.0)
    # Stage 3: hidden2 (60 -> 30).
    h = jnp.maximum(
        jnp.dot(h, w3_ref[...], preferred_element_type=jnp.float32), 0.0)
    # Stage 4: output (30 -> n_actions), no activation; lane-dense padded store.
    o_ref[...] = jnp.dot(h, w4_ref[...], preferred_element_type=jnp.float32)


# ----------------------------------------------------------------------------
# Host-side (numpy) weight packing — done ONCE, outside the hot path.
# ----------------------------------------------------------------------------
def _im2col_3x3(w):
    """M (49,25) s.t. flatten(x_7x7) @ M == valid 3x3 conv, flattened 5x5 (row-major)."""
    M = np.zeros((49, 25), np.float32)
    for oi in range(5):
        for oj in range(5):
            p = oi * 5 + oj
            for ki in range(3):
                for kj in range(3):
                    M[(oi + ki) * 7 + (oj + kj), p] = w[ki, kj]
    return M


def pack_weights(params, n_actions):
    g = lambda k: np.asarray(params[k], np.float32)

    # Stage 1: (K_PAD, P). Block diagonal over [conv1|conv2|conv3|lin4], bias row at 163.
    w1 = np.zeros((K_PAD, P), np.float32)
    w1[0:49, 0:25] = _im2col_3x3(g("cw1"))
    w1[49:98, 25:50] = _im2col_3x3(g("cw2"))
    w1[98:147, 50:75] = _im2col_3x3(g("cw3"))
    w1[147:163, 75:87] = g("w4")
    w1[163, 0:25] = g("cb1").ravel()[0]
    w1[163, 25:50] = g("cb2").ravel()[0]
    w1[163, 50:75] = g("cb3").ravel()[0]
    w1[163, 75:87] = g("b4").ravel()
    w1[163, 87] = 1.0                      # propagate the ones column (ReLU(1)=1)

    # Stage 2: (P, P). Block diagonal over hidden11/12/13/14, bias row at 87.
    w2 = np.zeros((P, P), np.float32)
    w2[0:25, 0:18] = g("wh11")
    w2[25:50, 18:36] = g("wh12")
    w2[50:75, 36:54] = g("wh13")
    w2[75:87, 54:60] = g("wh14")
    w2[87, 0:18] = g("bh11").ravel()
    w2[87, 18:36] = g("bh12").ravel()
    w2[87, 36:54] = g("bh13").ravel()
    w2[87, 54:60] = g("bh14").ravel()
    w2[87, 60] = 1.0

    # Stage 3: (P, P). hidden2 (60 -> 30), bias row at 60.
    w3 = np.zeros((P, P), np.float32)
    w3[0:60, 0:30] = g("wh2")
    w3[60, 0:30] = g("bh2").ravel()
    w3[60, 30] = 1.0

    # Stage 4: (P, P). output (30 -> n_actions), bias row at 30, columns zero-padded.
    w4 = np.zeros((P, P), np.float32)
    w4[0:30, 0:n_actions] = g("wo")
    w4[30, 0:n_actions] = g("bo").ravel()

    return tuple(jnp.asarray(w) for w in (w1, w2, w3, w4))


# ----------------------------------------------------------------------------
# Parameter init (PyTorch-style uniform fan-in init).
# ----------------------------------------------------------------------------
def init_params(key, n_actions):
    keys = jax.random.split(key, 12)

    def lin(k, fan_in, fan_out):
        k1, k2 = jax.random.split(k)
        bound = 1.0 / math.sqrt(fan_in)
        w = jax.random.uniform(k1, (fan_in, fan_out), jnp.float32, -bound, bound)
        b = jax.random.uniform(k2, (1, fan_out), jnp.float32, -bound, bound)
        return w, b

    def conv(k):
        k1, k2 = jax.random.split(k)
        bound = 1.0 / math.sqrt(9.0)
        w = jax.random.uniform(k1, (3, 3), jnp.float32, -bound, bound)
        b = jax.random.uniform(k2, (1, 1), jnp.float32, -bound, bound)
        return w, b

    p = {}
    p["cw1"], p["cb1"] = conv(keys[0])
    p["cw2"], p["cb2"] = conv(keys[1])
    p["cw3"], p["cb3"] = conv(keys[2])
    p["w4"], p["b4"] = lin(keys[3], 16, 12)
    p["wh11"], p["bh11"] = lin(keys[4], 25, 18)
    p["wh12"], p["bh12"] = lin(keys[5], 25, 18)
    p["wh13"], p["bh13"] = lin(keys[6], 25, 18)
    p["wh14"], p["bh14"] = lin(keys[7], 12, 6)
    p["wh2"], p["bh2"] = lin(keys[8], 60, 30)
    p["wo"], p["bo"] = lin(keys[9], 30, n_actions)
    return p


# ----------------------------------------------------------------------------
# Forward wrapper: pack activations into one lane-dense slab, batch-tiled grid.
# ----------------------------------------------------------------------------
def _round_up(x, m):
    return ((x + m - 1) // m) * m


def dqn_forward(x1, x2, x3, x4, packed_w, n_actions):
    B = x1.shape[0]
    # NCHW (B,1,7,7) -> row-major flatten (B,49); matches x.view(x.size(0), -1).
    x1f = x1.reshape(B, 49).astype(jnp.float32)
    x2f = x2.reshape(B, 49).astype(jnp.float32)
    x3f = x3.reshape(B, 49).astype(jnp.float32)
    x4f = x4.astype(jnp.float32)
    ones = jnp.ones((B, 1), jnp.float32)

    x_slab = jnp.concatenate([x1f, x2f, x3f, x4f, ones], axis=1)      # (B, 164)

    tile_b = 256 if B >= 256 else _round_up(B, 8)
    b_pad = _round_up(B, tile_b)
    x_slab = jnp.pad(x_slab, ((0, b_pad - B), (0, K_PAD - x_slab.shape[1])))

    w1, w2, w3, w4 = packed_w

    out = pl.pallas_call(
        dqn_kernel,
        out_shape=jax.ShapeDtypeStruct((b_pad, P), jnp.float32),
        grid_spec=pltpu.PrefetchScalarGridSpec(
            num_scalar_prefetch=0,
            grid=(b_pad // tile_b,),
            in_specs=[
                pl.BlockSpec((tile_b, K_PAD), lambda i: (i, 0)),   # activation slab
                pl.BlockSpec((K_PAD, P), lambda i: (0, 0)),        # stage-1 weights (resident)
                pl.BlockSpec((P, P), lambda i: (0, 0)),            # stage-2 weights
                pl.BlockSpec((P, P), lambda i: (0, 0)),            # stage-3 weights
                pl.BlockSpec((P, P), lambda i: (0, 0)),            # stage-4 weights
            ],
            out_specs=pl.BlockSpec((tile_b, P), lambda i: (i, 0)),
        ),
        compiler_params=pltpu.CompilerParams(
            dimension_semantics=("parallel",)),
    )(x_slab, w1, w2, w3, w4)

    return out[:B, :n_actions]


# ----------------------------------------------------------------------------
# Pure-JAX reference (direct conv via shifts) for a correctness check.
# ----------------------------------------------------------------------------
def dqn_reference(x1, x2, x3, x4, params):
    def conv_relu_flat(x, w, b):  # x: (B,1,7,7)
        xs = x[:, 0]
        acc = jnp.zeros((x.shape[0], 5, 5), jnp.float32)
        for ki in range(3):
            for kj in range(3):
                acc = acc + xs[:, ki:ki + 5, kj:kj + 5] * w[ki, kj]
        return jax.nn.relu(acc + b[0, 0]).reshape(x.shape[0], -1)

    def lin_relu(h, w, b):
        return jax.nn.relu(h @ w + b)

    h1 = lin_relu(conv_relu_flat(x1, params["cw1"], params["cb1"]),
                  params["wh11"], params["bh11"])
    h2 = lin_relu(conv_relu_flat(x2, params["cw2"], params["cb2"]),
                  params["wh12"], params["bh12"])
    h3 = lin_relu(conv_relu_flat(x3, params["cw3"], params["cb3"]),
                  params["wh13"], params["bh13"])
    h4 = lin_relu(lin_relu(x4, params["w4"], params["b4"]),
                  params["wh14"], params["bh14"])
    h = jax.nn.relu(jnp.concatenate([h1, h2, h3, h4], axis=1) @ params["wh2"]
                    + params["bh2"])
    return h @ params["wo"] + params["bo"]


if __name__ == "__main__":
    B, n_actions = 4, 6
    key = jax.random.PRNGKey(0)
    k1, k2, k3, k4, kp = jax.random.split(key, 5)

    x1 = jax.random.normal(k1, (B, 1, 7, 7), jnp.float32)
    x2 = jax.random.normal(k2, (B, 1, 7, 7), jnp.float32)
    x3 = jax.random.normal(k3, (B, 1, 7, 7), jnp.float32)
    x4 = jax.random.normal(k4, (B, 16), jnp.float32)

    params = init_params(kp, n_actions)
    packed_w = pack_weights(params, n_actions)   # host-side, once

    out = dqn_forward(x1, x2, x3, x4, packed_w, n_actions)
    out = jax.block_until_ready(out)

    ref = jax.block_until_ready(dqn_reference(x1, x2, x3, x4, params))
    np.testing.assert_allclose(np.asarray(out), np.asarray(ref), rtol=1e-4, atol=1e-4)

    print("KERNEL_OK")
</pallas_src>

<mosaic_0001>
module attributes {stable_mosaic.version = 11 : i64} {
  func.func @dqn_kernel(%arg0: i32, %arg1: memref<8x256xf32, #tpu.memory_space<vmem>>, %arg2: memref<256x128xf32, #tpu.memory_space<vmem>>, %arg3: memref<128x128xf32, #tpu.memory_space<vmem>>, %arg4: memref<128x128xf32, #tpu.memory_space<vmem>>, %arg5: memref<128x128xf32, #tpu.memory_space<vmem>>, %arg6: memref<8x128xf32, #tpu.memory_space<vmem>>) attributes {dimension_semantics = [#tpu.dimension_semantics<parallel>], iteration_bounds = array<i64: 1>, scalar_prefetch = 0 : i64, scratch_operands = 0 : i64, tpu.core_type = #tpu.core_type<tc>, window_params = [{transform_indices = @transform_0, window_bounds = array<i64: 8, 256>}, {pipeline_mode = #tpu.pipeline_mode<synchronous>, transform_indices = @transform_1, window_bounds = array<i64: 256, 128>}, {pipeline_mode = #tpu.pipeline_mode<synchronous>, transform_indices = @transform_2, window_bounds = array<i64: 128, 128>}, {pipeline_mode = #tpu.pipeline_mode<synchronous>, transform_indices = @transform_3, window_bounds = array<i64: 128, 128>}, {pipeline_mode = #tpu.pipeline_mode<synchronous>, transform_indices = @transform_4, window_bounds = array<i64: 128, 128>}, {transform_indices = @transform_5, window_bounds = array<i64: 8, 128>}]} {
    %c0 = arith.constant 0 : index
    %c0_0 = arith.constant 0 : index
    %0 = vector.load %arg1[%c0, %c0_0] : memref<8x256xf32, #tpu.memory_space<vmem>>, vector<8x256xf32>
    %c0_1 = arith.constant 0 : index
    %c0_2 = arith.constant 0 : index
    %1 = vector.load %arg2[%c0_1, %c0_2] : memref<256x128xf32, #tpu.memory_space<vmem>>, vector<256x128xf32>
    %cst = arith.constant dense<0.000000e+00> : vector<8x128xf32>
    %2 = tpu.matmul %0, %1, %cst {dimension_numbers = #tpu.dot_dimension_numbers<[1], [0], [0], [1], [0, 0, 1, 1], [], []>} : vector<8x256xf32>, vector<256x128xf32>, vector<8x128xf32> -> vector<8x128xf32>
    %cst_3 = arith.constant 0.000000e+00 : f32
    %3 = vector.broadcast %cst_3 : f32 to vector<8x128xf32>
    %4 = arith.maximumf %2, %3 : vector<8x128xf32>
    %c0_4 = arith.constant 0 : index
    %c0_5 = arith.constant 0 : index
    %5 = vector.load %arg3[%c0_4, %c0_5] : memref<128x128xf32, #tpu.memory_space<vmem>>, vector<128x128xf32>
    %cst_6 = arith.constant dense<0.000000e+00> : vector<8x128xf32>
    %6 = tpu.matmul %4, %5, %cst_6 {dimension_numbers = #tpu.dot_dimension_numbers<[1], [0], [0], [1], [0, 0, 1, 1], [], []>} : vector<8x128xf32>, vector<128x128xf32>, vector<8x128xf32> -> vector<8x128xf32>
    %cst_7 = arith.constant 0.000000e+00 : f32
    %7 = vector.broadcast %cst_7 : f32 to vector<8x128xf32>
    %8 = arith.maximumf %6, %7 : vector<8x128xf32>
    %c0_8 = arith.constant 0 : index
    %c0_9 = arith.constant 0 : index
    %9 = vector.load %arg4[%c0_8, %c0_9] : memref<128x128xf32, #tpu.memory_space<vmem>>, vector<128x128xf32>
    %cst_10 = arith.constant dense<0.000000e+00> : vector<8x128xf32>
    %10 = tpu.matmul %8, %9, %cst_10 {dimension_numbers = #tpu.dot_dimension_numbers<[1], [0], [0], [1], [0, 0, 1, 1], [], []>} : vector<8x128xf32>, vector<128x128xf32>, vector<8x128xf32> -> vector<8x128xf32>
    %cst_11 = arith.constant 0.000000e+00 : f32
    %11 = vector.broadcast %cst_11 : f32 to vector<8x128xf32>
    %12 = arith.maximumf %10, %11 : vector<8x128xf32>
    %c0_12 = arith.constant 0 : index
    %c0_13 = arith.constant 0 : index
    %13 = vector.load %arg5[%c0_12, %c0_13] : memref<128x128xf32, #tpu.memory_space<vmem>>, vector<128x128xf32>
    %cst_14 = arith.constant dense<0.000000e+00> : vector<8x128xf32>
    %14 = tpu.matmul %12, %13, %cst_14 {dimension_numbers = #tpu.dot_dimension_numbers<[1], [0], [0], [1], [0, 0, 1, 1], [], []>} : vector<8x128xf32>, vector<128x128xf32>, vector<8x128xf32> -> vector<8x128xf32>
    %c0_15 = arith.constant 0 : index
    %c0_16 = arith.constant 0 : index
    %15 = vector.load %arg6[%c0_15, %c0_16] : memref<8x128xf32, #tpu.memory_space<vmem>>, vector<8x128xf32>
    tpu.vector_store %arg6[%c0_15, %c0_16], %14 {strides = array<i32>} : memref<8x128xf32, #tpu.memory_space<vmem>>, vector<8x128xf32>,
    return
  }
  func.func @transform_0(%arg0: i32) -> (i32, i32) {
    %c0_i32 = arith.constant 0 : i32
    %c0_i32_0 = arith.constant 0 : i32
    return %arg0, %c0_i32 : i32, i32
  }
  func.func @transform_1(%arg0: i32) -> (i32, i32) {
    %c0_i32 = arith.constant 0 : i32
    %c0_i32_0 = arith.constant 0 : i32
    %c0_i32_1 = arith.constant 0 : i32
    return %c0_i32, %c0_i32_0 : i32, i32
  }
  func.func @transform_2(%arg0: i32) -> (i32, i32) {
    %c0_i32 = arith.constant 0 : i32
    %c0_i32_0 = arith.constant 0 : i32
    %c0_i32_1 = arith.constant 0 : i32
    return %c0_i32, %c0_i32_0 : i32, i32
  }
  func.func @transform_3(%arg0: i32) -> (i32, i32) {
    %c0_i32 = arith.constant 0 : i32
    %c0_i32_0 = arith.constant 0 : i32
    %c0_i32_1 = arith.constant 0 : i32
    return %c0_i32, %c0_i32_0 : i32, i32
  }
  func.func @transform_4(%arg0: i32) -> (i32, i32) {
    %c0_i32 = arith.constant 0 : i32
    %c0_i32_0 = arith.constant 0 : i32
    %c0_i32_1 = arith.constant 0 : i32
    return %c0_i32, %c0_i32_0 : i32, i32
  }
  func.func @transform_5(%arg0: i32) -> (i32, i32) {
    %c0_i32 = arith.constant 0 : i32
    %c0_i32_0 = arith.constant 0 : i32
    return %arg0, %c0_i32 : i32, i32
  }
}

</mosaic_0001>

<bundles_post_ra>
// kernel: tpu_custom_call.1
= control target key start
LH: loop header
LB: loop body
LE: loop exit
PB: predicated region body
PF: predicated region fallthrough
CT: control target
= control target key end

     0   :  { %10 = vsyncpa [#allocation3], 0  ;;  %s518_s0 = inlined_call_operand.hbm [shape: f32[8,256], index: 0, kind: input, shape index: {}]   ;;  %s519_s1 = inlined_call_operand.hbm [shape: f32[256,128], index: 1, kind: input, shape index: {}]   ;;  %s520_s2 = inlined_call_operand.hbm [shape: f32[128,128], index: 2, kind: input, shape index: {}]   ;;  %s521_s3 = inlined_call_operand.hbm [shape: f32[128,128], index: 3, kind: input, shape index: {}]   ;;  %s522_s4 = inlined_call_operand.hbm [shape: f32[128,128], index: 4, kind: input, shape index: {}]   ;;  %s523_s5 = inlined_call_operand.hbm [shape: f32[8,128], index: 5, kind: output, shape index: {}]  }
   0x1   :  { %11 = vsyncpa [#allocation6], 0 }
   0x2   :  { %12 = vsyncpa [#allocation9], 0  ;;  %s29_s20 = sshll.u32 %s519_s1, 4  ;;  %s30_s20 = int_to_ptr.hbm [resolvable:$true] %s29_s20 }
   0x3   :  { %13 = vsyncpa [#allocation4], 0  ;;  %s462_s21 = smov [#allocation5]   ;;  %s55_s25 = sshll.u32 %s521_s3, 4  ;;  %s56_s25 = int_to_ptr.hbm [resolvable:$true] %s55_s25 }
   0x4   :  { %s31_s22 = sshll.u32 %s462_s21, 4  ;;  %s463_s26 = smov 128   ;;  %s32_s22 = int_to_ptr.vmem [resolvable:$true] %s31_s22 }
   0x5   :  { %s464_s27 = smov 8   ;;  %s465_s28 = smov [#allocation8]  }
   0x6   :  { %37 = dma.hbm_to_vmem [thread:$0]  %s30_s20, 4096, %s32_s22, [#allocation6], %s463_s26, %s463_s26, %s464_s27  }
   0x7   :  { %s57_s29 = sshll.u32 %s465_s28, 4  ;;  %s19_s7 = sshll.u32 %s518_s0, 4  ;;  %s58_s29 = int_to_ptr.vmem [resolvable:$true] %s57_s29  ;;  %s20_s7 = int_to_ptr.hbm [resolvable:$true] %s19_s7 }
   0x8   :  { %63 = dma.hbm_to_vmem [thread:$0]  %s56_s25, 2048, %s58_s29, [#allocation9], %s463_s26, %s463_s26, %s464_s27  }
   0x9   :  { %s42_s9 = sshll.u32 %s520_s2, 4  ;;  %s466_s10 = smov [#allocation2]   ;;  %s43_s9 = int_to_ptr.hbm [resolvable:$true] %s42_s9 }
   0xa   :  { %s21_s11 = sshll.u32 %s466_s10, 4  ;;  %s467_s3 = smov [#allocation7]   ;;  %s22_s11 = int_to_ptr.vmem [resolvable:$true] %s21_s11 }
   0xb   :  { %24 = dma.hbm_to_vmem [thread:$0]  %s20_s7, 256, %s22_s11, [#allocation3]  }
   0xc   :  { %s44_s12 = sshll.u32 %s467_s3, 4  ;;  %s68_s15 = sshll.u32 %s522_s4, 4  ;;  %s45_s12 = int_to_ptr.vmem [resolvable:$true] %s44_s12  ;;  %s69_s15 = int_to_ptr.hbm [resolvable:$true] %s68_s15 }
   0xd   :  { %50 = dma.hbm_to_vmem [thread:$0]  %s43_s9, 2048, %s45_s12, [#allocation6], %s463_s26, %s463_s26, %s464_s27  }
   0xe   :  { %s468_s0 = smov [#allocation10]  }
   0xf   :  { %s70_s16 = sshll.u32 %s468_s0, 4  ;;  %s71_s16 = int_to_ptr.vmem [resolvable:$true] %s70_s16 }
  0x10   :  { %76 = dma.hbm_to_vmem [thread:$0]  %s69_s15, 2048, %s71_s16, [#allocation9], %s463_s26, %s463_s26, %s464_s27  }
  0x11   :  { %454 = dma.done.wait [#allocation3], 256  }
  0x12   :  { %455 = vsyncadd [#allocation3], 4294967040 }
  0x13   :  { %456 = dma.done.wait [#allocation6], 6144  }
  0x14   :  { %457 = vsyncadd [#allocation6], 4294961152 }
  0x15   :  { %458 = dma.done.wait [#allocation9], 4096  }
  0x16   :  { %459 = vsyncadd [#allocation9], 4294963200  ;;  %v114_v0 = vld [vmem:[#allocation5 + $0x78] sm:$0xff]  ;;  %v113_v2 = vld [vmem:[#allocation5 + $0x70] sm:$0xff]  ;;  %s469_s2 = smov [#allocation11]   ;;  %s290_s19 = sshll.u32 %s523_s5, 4  ;;  %s291_s19 = int_to_ptr.hbm [resolvable:$true] %s290_s19 }
  0x17   :  { %v130_v1 = vld [vmem:[#allocation5 + $0xf8] sm:$0xff]  ;;  %131 = vmatpush.msra.mxu0 %v114_v0  ;;  %v129_v3 = vld [vmem:[#allocation5 + $0xf0] sm:$0xff]  ;;  %v112_v4 = vld [vmem:[#allocation5 + $0x68] sm:$0xff]  ;;  %s288_s4 = sshll.u32 %s469_s2, 4  ;;  %s289_s4 = int_to_ptr.vmem [resolvable:$true] %s288_s4 }
  0x18   :  { %151 = vmatpush.msra.mxu1 %v130_v1  ;;  %v128_v5 = vld [vmem:[#allocation5 + $0xe8] sm:$0xff]  ;;  %v111_v6 = vld [vmem:[#allocation5 + $0x60] sm:$0xff]  ;;  %v110_v8 = vld [vmem:[#allocation5 + $0x58] sm:$0xff] }
  0x19   :  { %132 = vmatpush.msra.mxu0 %v113_v2  ;;  %v127_v7 = vld [vmem:[#allocation5 + $0xe0] sm:$0xff]  ;;  %v126_v9 = vld [vmem:[#allocation5 + $0xd8] sm:$0xff]  ;;  %v109_v10 = vld [vmem:[#allocation5 + $0x50] sm:$0xff] }
  0x1a   :  { %152 = vmatpush.msra.mxu1 %v129_v3  ;;  %v125_v11 = vld [vmem:[#allocation5 + $0xd0] sm:$0xff]  ;;  %v108_v12 = vld [vmem:[#allocation5 + $0x48] sm:$0xff]  ;;  %v187_v14 = vld [vmem:[#allocation7 + $0x78] sm:$0xff] }
  0x1b   :  { %133 = vmatpush.msra.mxu0 %v112_v4  ;;  %v124_v13 = vld [vmem:[#allocation5 + $0xc8] sm:$0xff]  ;;  %v186_v15 = vld [vmem:[#allocation7 + $0x70] sm:$0xff]  ;;  %v107_v16 = vld [vmem:[#allocation5 + $0x40] sm:$0xff]  ;;  %188 = vmatpush.msra.mxu2 %v187_v14 }
  0x1c   :  { %153 = vmatpush.msra.mxu1 %v128_v5  ;;  %v123_v17 = vld [vmem:[#allocation5 + $0xc0] sm:$0xff]  ;;  %v185_v18 = vld [vmem:[#allocation7 + $0x68] sm:$0xff]  ;;  %v106_v19 = vld [vmem:[#allocation5 + $0x38] sm:$0xff] }
  0x1d   :  { %134 = vmatpush.msra.mxu0 %v111_v6  ;;  %v122_v20 = vld [vmem:[#allocation5 + $0xb8] sm:$0xff]  ;;  %189 = vmatpush.msra.mxu2 %v186_v15  ;;  %v184_v21 = vld [vmem:[#allocation7 + $0x60] sm:$0xff]  ;;  %v105_v22 = vld [vmem:[#allocation5 + $0x30] sm:$0xff] }
  0x1e   :  { %154 = vmatpush.msra.mxu1 %v127_v7  ;;  %v121_v23 = vld [vmem:[#allocation5 + $0xb0] sm:$0xff]  ;;  %v183_v24 = vld [vmem:[#allocation7 + $0x58] sm:$0xff]  ;;  %v104_v25 = vld [vmem:[#allocation5 + $0x28] sm:$0xff] }
  0x1f   :  { %135 = vmatpush.msra.mxu0 %v110_v8  ;;  %190 = vmatpush.msra.mxu2 %v185_v18  ;;  %v120_v26 = vld [vmem:[#allocation5 + $0xa8] sm:$0xff]  ;;  %v182_v27 = vld [vmem:[#allocation7 + $0x50] sm:$0xff]  ;;  %v103_v28 = vld [vmem:[#allocation5 + $0x20] sm:$0xff] }
  0x20   :  { %155 = vmatpush.msra.mxu1 %v126_v9  ;;  %v119_v29 = vld [vmem:[#allocation5 + $0xa0] sm:$0xff]  ;;  %v181_v30 = vld [vmem:[#allocation7 + $0x48] sm:$0xff]  ;;  %v102_v31 = vld [vmem:[#allocation5 + $0x18] sm:$0xff] }
  0x21   :  { %136 = vmatpush.msra.mxu0 %v109_v10  ;;  %191 = vmatpush.msra.mxu2 %v184_v21  ;;  %v118_v32 = vld [vmem:[#allocation5 + $0x98] sm:$0xff]  ;;  %v180_v33 = vld [vmem:[#allocation7 + $0x40] sm:$0xff]  ;;  %v101_v34 = vld [vmem:[#allocation5 + $0x10] sm:$0xff] }
  0x22   :  { %156 = vmatpush.msra.mxu1 %v125_v11  ;;  %v117_v35 = vld [vmem:[#allocation5 + $0x90] sm:$0xff]  ;;  %v179_v36 = vld [vmem:[#allocation7 + $0x38] sm:$0xff]  ;;  %v100_v37 = vld [vmem:[#allocation5 + $0x8] sm:$0xff] }
  0x23   :  { %137 = vmatpush.msra.mxu0 %v108_v12  ;;  %192 = vmatpush.msra.mxu2 %v183_v24  ;;  %v116_v38 = vld [vmem:[#allocation5 + $0x88] sm:$0xff]  ;;  %v178_v39 = vld [vmem:[#allocation7 + $0x30] sm:$0xff]  ;;  %v99_v40 = vld [vmem:[#allocation5] sm:$0xff] }
  0x24   :  { %157 = vmatpush.msra.mxu1 %v124_v13  ;;  %v115_v41 = vld [vmem:[#allocation5 + $0x80] sm:$0xff]  ;;  %v97_v42 = vld [vmem:[#allocation2] sm:$0xff]  ;;  %v98_v43 = vld [vmem:[#allocation2 + $0x8] sm:$0xff] }
  0x25   :  { %138 = vmatpush.msra.mxu0 %v107_v16  ;;  %193 = vmatpush.msra.mxu2 %v182_v27  ;;  %v177_v44 = vld [vmem:[#allocation7 + $0x28] sm:$0xff]  ;;  %v176_v45 = vld [vmem:[#allocation7 + $0x20] sm:$0xff]  ;;  %v175_v46 = vld [vmem:[#allocation7 + $0x18] sm:$0xff] }
  0x26   :  { %158 = vmatpush.msra.mxu1 %v123_v17  ;;  %v174_v47 = vld [vmem:[#allocation7 + $0x10] sm:$0xff]  ;;  %v173_v48 = vld [vmem:[#allocation7 + $0x8] sm:$0xff]  ;;  %v172_v49 = vld [vmem:[#allocation7] sm:$0xff] }
  0x27   :  { %139 = vmatpush.msra.mxu0 %v106_v19  ;;  %194 = vmatpush.msra.mxu2 %v181_v30  ;;  %v224_v50 = vld [vmem:[#allocation8 + $0x78] sm:$0xff]  ;;  %v223_v51 = vld [vmem:[#allocation8 + $0x70] sm:$0xff]  ;;  %v222_v52 = vld [vmem:[#allocation8 + $0x68] sm:$0xff] }
  0x28   :  { %159 = vmatpush.msra.mxu1 %v122_v20  ;;  %225 = vmatpush.msra.mxu3 %v224_v50  ;;  %v221_v53 = vld [vmem:[#allocation8 + $0x60] sm:$0xff]  ;;  %v220_v54 = vld [vmem:[#allocation8 + $0x58] sm:$0xff]  ;;  %v219_v55 = vld [vmem:[#allocation8 + $0x50] sm:$0xff] }
  0x29   :  { %140 = vmatpush.msra.mxu0 %v105_v22  ;;  %195 = vmatpush.msra.mxu2 %v180_v33  ;;  %v218_v56 = vld [vmem:[#allocation8 + $0x48] sm:$0xff]  ;;  %v217_v57 = vld [vmem:[#allocation8 + $0x40] sm:$0xff]  ;;  %v216_v58 = vld [vmem:[#allocation8 + $0x38] sm:$0xff] }
  0x2a   :  { %160 = vmatpush.msra.mxu1 %v121_v23  ;;  %226 = vmatpush.msra.mxu3 %v223_v51  ;;  %v215_v59 = vld [vmem:[#allocation8 + $0x30] sm:$0xff]  ;;  %v214_v60 = vld [vmem:[#allocation8 + $0x28] sm:$0xff]  ;;  %v213_v61 = vld [vmem:[#allocation8 + $0x20] sm:$0xff] }
  0x2b   :  { %141 = vmatpush.msra.mxu0 %v104_v25  ;;  %196 = vmatpush.msra.mxu2 %v179_v36  ;;  %v212_v62 = vld [vmem:[#allocation8 + $0x18] sm:$0xff]  ;;  %v211_v63 = vld [vmem:[#allocation8 + $0x10] sm:$0xff]  ;;  %v210_v4 = vld [vmem:[#allocation8 + $0x8] sm:$0xff] }
  0x2c   :  { %161 = vmatpush.msra.mxu1 %v120_v26  ;;  %227 = vmatpush.msra.mxu3 %v222_v52  ;;  %v209_v5 = vld [vmem:[#allocation8] sm:$0xff]  ;;  %v261_v6 = vld [vmem:[#allocation10 + $0x78] sm:$0xff]  ;;  %v260_v7 = vld [vmem:[#allocation10 + $0x70] sm:$0xff] }
  0x2d   :  { %142 = vmatpush.msra.mxu0 %v103_v28  ;;  %197 = vmatpush.msra.mxu2 %v178_v39  ;;  %v259_v8 = vld [vmem:[#allocation10 + $0x68] sm:$0xff]  ;;  %v258_v9 = vld [vmem:[#allocation10 + $0x60] sm:$0xff]  ;;  %v257_v10 = vld [vmem:[#allocation10 + $0x58] sm:$0xff] }
  0x2e   :  { %162 = vmatpush.msra.mxu1 %v119_v29  ;;  %228 = vmatpush.msra.mxu3 %v221_v53  ;;  %v256_v11 = vld [vmem:[#allocation10 + $0x50] sm:$0xff]  ;;  %v255_v12 = vld [vmem:[#allocation10 + $0x48] sm:$0xff]  ;;  %v254_v13 = vld [vmem:[#allocation10 + $0x40] sm:$0xff] }
  0x2f   :  { %143 = vmatpush.msra.mxu0 %v102_v31  ;;  %198 = vmatpush.msra.mxu2 %v177_v44  ;;  %v253_v14 = vld [vmem:[#allocation10 + $0x38] sm:$0xff]  ;;  %v252_v15 = vld [vmem:[#allocation10 + $0x30] sm:$0xff]  ;;  %v251_v16 = vld [vmem:[#allocation10 + $0x28] sm:$0xff] }
  0x30   :  { %163 = vmatpush.msra.mxu1 %v118_v32  ;;  %229 = vmatpush.msra.mxu3 %v220_v54  ;;  %v250_v17 = vld [vmem:[#allocation10 + $0x20] sm:$0xff]  ;;  %v249_v18 = vld [vmem:[#allocation10 + $0x18] sm:$0xff]  ;;  %v248_v19 = vld [vmem:[#allocation10 + $0x10] sm:$0xff] }
  0x31   :  { %144 = vmatpush.msra.mxu0 %v101_v34  ;;  %199 = vmatpush.msra.mxu2 %v176_v45  ;;  %v247_v22 = vld [vmem:[#allocation10 + $0x8] sm:$0xff]  ;;  %v246_v23 = vld [vmem:[#allocation10] sm:$0xff] }
  0x32   :  { %164 = vmatpush.msra.mxu1 %v117_v35  ;;  %230 = vmatpush.msra.mxu3 %v219_v55 }
  0x33   :  { %145 = vmatpush.msra.mxu0 %v100_v37  ;;  %200 = vmatpush.msra.mxu2 %v175_v46 }
  0x34   :  { %165 = vmatpush.msra.mxu1 %v116_v38  ;;  %231 = vmatpush.msra.mxu3 %v218_v56 }
  0x35   :  { %146 = vmatpush.msra.mxu0 %v99_v40  ;;  %201 = vmatpush.msra.mxu2 %v174_v47 }
  0x36   :  { %166 = vmatpush.msra.mxu1 %v115_v41  ;;  %147 = vmatmul.f32.vlgmr.msra.gmra.mxu0 %v97_v42 }
  0x37   :  { %167 = vmatmul.f32.vlgmr.msra.gmra.mxu1 %v98_v43  ;;  %202 = vmatpush.msra.mxu2 %v173_v48 }
  0x38   :  { %232 = vmatpush.msra.mxu3 %v217_v57  ;;  %262 = vmatpush.msrb.mxu0 %v261_v6 }
  0x39   :  { %203 = vmatpush.msra.mxu2 %v172_v49 }
  0x3a   :  { %233 = vmatpush.msra.mxu3 %v216_v58  ;;  %263 = vmatpush.msrb.mxu0 %v260_v7 }
  0x3c   :  { %234 = vmatpush.msra.mxu3 %v215_v59  ;;  %264 = vmatpush.msrb.mxu0 %v259_v8 }
  0x3e   :  { %235 = vmatpush.msra.mxu3 %v214_v60  ;;  %265 = vmatpush.msrb.mxu0 %v258_v9 }
  0x40   :  { %236 = vmatpush.msra.mxu3 %v213_v61  ;;  %266 = vmatpush.msrb.mxu0 %v257_v10 }
  0x42   :  { %237 = vmatpush.msra.mxu3 %v212_v62  ;;  %267 = vmatpush.msrb.mxu0 %v256_v11 }
  0x44   :  { %238 = vmatpush.msra.mxu3 %v211_v63  ;;  %268 = vmatpush.msrb.mxu0 %v255_v12 }
  0x46   :  { %239 = vmatpush.msra.mxu3 %v210_v4  ;;  %269 = vmatpush.msrb.mxu0 %v254_v13 }
  0x48   :  { %240 = vmatpush.msra.mxu3 %v209_v5  ;;  %270 = vmatpush.msrb.mxu0 %v253_v14 }
  0x4a   :  { %271 = vmatpush.msrb.mxu0 %v252_v15 }
  0x4c   :  { %272 = vmatpush.msrb.mxu0 %v251_v16 }
  0x4e   :  { %273 = vmatpush.msrb.mxu0 %v250_v17 }
  0x50   :  { %274 = vmatpush.msrb.mxu0 %v249_v18 }
  0x52   :  { %275 = vmatpush.msrb.mxu0 %v248_v19 }
  0x54   :  { %276 = vmatpush.msrb.mxu0 %v247_v22 }
  0x56   :  { %277 = vmatpush.msrb.mxu0 %v246_v23 }
  0xb3   :  { %v148_v0 = vpop.f32.mrf.mxu0 }
  0xb4   :  { %v168_v1 = vpop.f32.mrf.mxu1 }
  0xb5   :  { %v169_v2 = vadd.f32 %v168_v1, %v148_v0 }
  0xb7   :  { %v171_v3 = vmax.f32 %v169_v2, 0.0 }
  0xb9   :  { %204 = vmatmul.f32.vlgmr.msra.gmra.mxu2 %v171_v3 }
 0x13c   :  { %v205_v20 = vpop.f32.mrf.mxu2 }
 0x13d   :  { %v208_v21 = vmax.f32 %v205_v20, 0.0 }
 0x13f   :  { %241 = vmatmul.f32.vlgmr.msra.gmra.mxu3 %v208_v21 }
 0x1c2   :  { %v242_v24 = vpop.f32.mrf.mxu3 }
 0x1c3   :  { %v245_v25 = vmax.f32 %v242_v24, 0.0 }
 0x1c5   :  { %278 = vmatmul.f32.vlgmr.msrb.gmra.mxu0 %v245_v25 }
 0x242   :  { %v279_v26 = vpop.f32.mrf.mxu0 }
 0x243   :  { %282 = vst [vmem:[#allocation11] sm:$0xff] %v279_v26 }
 0x244   :  { %293 = dma.vmem_to_hbm [thread:$0]  %s289_s4, 128, %s291_s19, [#allocation4]  }
 0x245   :  { %460 = dma.done.wait [#allocation4], 128  }
 0x246   :  { %461 = vsyncadd [#allocation4], 4294967168 }
 0x247   :  { %298 = vsyncpa [#allocation3], 1 }
 0x248   :  { %299 = vsyncpa [#allocation6], 1 }
 0x249   :  { %300 = vsyncpa [#allocation9], 1 }
 0x24a   :  { %301 = vsyncpa [#allocation4], 1 }

</bundles_post_ra>
